<compile_context>
chip_gen: v5e
topology: v5e:2x2
jax: 0.10.0
libtpu: 0.0.40
codegen_flags: <defaults>
</compile_context>

<pallas_src>
import functools

import jax
import jax.numpy as jnp
from jax.experimental import pallas as pl
from jax.experimental.pallas import tpu as pltpu


def _router_gap_kernel(x_ref, wexp_ref, cbias_ref, pcol_ref, pb_ref, out_ref, *,
                       kh_total, oh, inv_p, apply_relu):
    """One batch element per grid step.

    x_ref:     [1, H, W*C]      flattened NHWC input rows
    wexp_ref:  [KH, W*C, NL]    banded (Toeplitz) conv weight, N padded to NL lanes
    cbias_ref: [1, NL]          conv bias tiled over output width (zeros in padding)
    pcol_ref:  [1, NL]          fused GAP+FC row vector (lin_w per (ow, g), or pool mask)
    pb_ref:    [1, 1]           linear bias (0 when ngf == 1)
    out_ref:   [1, 1, 1]        sigmoid probability
    """
    xv = x_ref[0]                                                   # [H, W*C]

    # Convolution: accumulate over kernel rows; each step is one MXU matmul.
    conv = jnp.dot(xv[0:oh, :], wexp_ref[0],
                   preferred_element_type=jnp.float32)              # [OH, NL]
    for kh in range(1, kh_total):
        conv = conv + jnp.dot(xv[kh:kh + oh, :], wexp_ref[kh],
                              preferred_element_type=jnp.float32)
    conv = conv + cbias_ref[...]                                    # + bias per (ow, g)

    if apply_relu:                                                  # ngf != 1 path
        conv = jnp.maximum(conv, 0.0)

    # Fused global-average-pool + Linear(ngf, 1):
    #   logits = (1/P) * sum_{oh, ow, g} act[oh, ow*G+g] * lin_w[g] + lin_b
    t = jnp.sum(conv * pcol_ref[...], axis=1, keepdims=True)        # [OH, 1] lane reduce
    logits = jnp.sum(t, axis=0, keepdims=True) * inv_p + pb_ref[...]  # [1, 1]

    out_ref[...] = (1.0 / (1.0 + jnp.exp(-logits))).reshape(1, 1, 1)


def router_gap_forward(x, conv_w, conv_b, lin_w, lin_b):
    """RouterGAP forward (soft_decision=True path).

    x:      [B, C, H, W] float32 (NCHW, as in PyTorch)
    conv_w: [ngf, C, KH, KW], conv_b: [ngf]
    lin_w:  [1, ngf], lin_b: [1]   (ignored when ngf == 1, matching the module)
    returns: [B] sigmoid probabilities
    """
    B, C, H, W = x.shape
    G, _, KH, KW = conv_w.shape
    OH, OW = H - KH + 1, W - KW + 1
    P = OH * OW
    NL = max(128, -(-(OW * G) // 128) * 128)        # lane-dense padded matmul N dim

    x = x.astype(jnp.float32)
    # NHWC with (w, c) flattened into one lane axis: xf[b, h, w*C + c] = x[b, c, h, w]
    xf = jnp.transpose(x, (0, 2, 3, 1)).reshape(B, H, W * C)

    # --- banded ("Toeplitz") weight expansion; weight-only, precompute once in practice ---
    # Wexp[kh, w*C + c, ow*G + g] = conv_w[g, c, kh, w - ow]  if 0 <= w - ow < KW else 0
    w_t = jnp.transpose(conv_w.astype(jnp.float32), (2, 3, 1, 0))        # [KH, KW, C, G]
    w_ids = jnp.arange(W)
    ow_ids = jnp.arange(OW)
    kw_rel = w_ids[:, None] - ow_ids[None, :]                            # [W, OW]
    valid = ((kw_rel >= 0) & (kw_rel < KW)).astype(jnp.float32)
    kw_safe = jnp.clip(kw_rel, 0, KW - 1)
    gathered = w_t[:, kw_safe, :, :]                                     # [KH, W, OW, C, G]
    gathered = gathered * valid[None, :, :, None, None]
    wexp = jnp.transpose(gathered, (0, 1, 3, 2, 4)).reshape(KH, W * C, OW * G)
    wexp = jnp.pad(wexp, ((0, 0), (0, 0), (0, NL - OW * G)))             # [KH, W*C, NL]

    cbias = jnp.pad(jnp.tile(conv_b.astype(jnp.float32), OW),
                    (0, NL - OW * G)).reshape(1, NL)

    if G != 1:
        # pcol carries lin_w[g] at every (ow, g) position -> GAP and FC fuse into one reduce.
        pcol = jnp.pad(jnp.tile(lin_w.astype(jnp.float32).reshape(G), OW),
                       (0, NL - OW * G)).reshape(1, NL)
        pb = lin_b.astype(jnp.float32).reshape(1, 1)
    else:
        # PyTorch ngf==1 path: no ReLU, no Linear — pure mean then sigmoid.
        pcol = jnp.pad(jnp.ones((OW,), jnp.float32), (0, NL - OW)).reshape(1, NL)
        pb = jnp.zeros((1, 1), jnp.float32)

    kernel = functools.partial(_router_gap_kernel, kh_total=KH, oh=OH,
                               inv_p=1.0 / float(P), apply_relu=(G != 1))

    out = pl.pallas_call(
        kernel,
        out_shape=jax.ShapeDtypeStruct((B, 1, 1), jnp.float32),
        grid=(B,),
        in_specs=[
            pl.BlockSpec((1, H, W * C), lambda b: (b, 0, 0)),
            pl.BlockSpec((KH, W * C, NL), lambda b: (0, 0, 0)),
            pl.BlockSpec((1, NL), lambda b: (0, 0)),
            pl.BlockSpec((1, NL), lambda b: (0, 0)),
            pl.BlockSpec((1, 1), lambda b: (0, 0)),
        ],
        out_specs=pl.BlockSpec((1, 1, 1), lambda b: (b, 0, 0)),
        compiler_params=pltpu.CompilerParams(
            dimension_semantics=("parallel",),
            vmem_limit_bytes=16 * 1024 * 1024,
        ),
    )(xf, wexp, cbias, pcol, pb)
    return out[:, 0, 0]                                                  # [B]


if __name__ == "__main__":
    B, C, H, W = 2, 4, 16, 16
    ngf, kernel_size = 5, 7
    if max(W, H) < kernel_size:              # mirror the module's shrink logic
        kernel_size = max(W, H)

    key = jax.random.PRNGKey(0)
    k1, k2, k3, k4, k5, k6, k7 = jax.random.split(key, 7)
    x = jax.random.normal(k1, (B, C, H, W), jnp.float32)
    conv_w = jax.random.normal(k2, (ngf, C, kernel_size, kernel_size), jnp.float32) * 0.1
    conv_b = jax.random.normal(k3, (ngf,), jnp.float32) * 0.1
    lin_w = jax.random.normal(k4, (1, ngf), jnp.float32) * 0.1
    lin_b = jax.random.normal(k5, (1,), jnp.float32) * 0.1

    fwd = jax.jit(router_gap_forward)

    # --- ngf > 1 path ---
    out = jax.block_until_ready(fwd(x, conv_w, conv_b, lin_w, lin_b))
    ref_conv = jax.lax.conv_general_dilated(
        x, conv_w, window_strides=(1, 1), padding="VALID",
        dimension_numbers=("NCHW", "OIHW", "NCHW")) + conv_b[None, :, None, None]
    ref = jax.nn.relu(ref_conv).mean(axis=(2, 3))        # [B, ngf]
    ref = ref @ lin_w.T + lin_b                          # [B, 1]
    ref = jax.nn.sigmoid(ref[:, 0])                      # [B]
    assert out.shape == (B,)
    assert jnp.allclose(out, ref, atol=1e-4), (out, ref)

    # --- ngf == 1 path (no ReLU, no Linear, per the PyTorch module) ---
    conv_w1 = jax.random.normal(k6, (1, C, kernel_size, kernel_size), jnp.float32) * 0.1
    conv_b1 = jax.random.normal(k7, (1,), jnp.float32) * 0.1
    out1 = jax.block_until_ready(
        fwd(x, conv_w1, conv_b1, jnp.zeros((1, 1), jnp.float32), jnp.zeros((1,), jnp.float32)))
    ref1_conv = jax.lax.conv_general_dilated(
        x, conv_w1, window_strides=(1, 1), padding="VALID",
        dimension_numbers=("NCHW", "OIHW", "NCHW")) + conv_b1[None, :, None, None]
    ref1 = jax.nn.sigmoid(ref1_conv.mean(axis=(2, 3))[:, 0])
    assert out1.shape == (B,)
    assert jnp.allclose(out1, ref1, atol=1e-4), (out1, ref1)

    print("KERNEL_OK")
</pallas_src>

<mosaic_0001>
module attributes {stable_mosaic.version = 11 : i64} {
  func.func @_router_gap_kernel(%arg0: i32, %arg1: memref<1x16x64xf32, #tpu.memory_space<vmem>>, %arg2: memref<7x64x128xf32, #tpu.memory_space<vmem>>, %arg3: memref<1x128xf32, #tpu.memory_space<vmem>>, %arg4: memref<1x128xf32, #tpu.memory_space<vmem>>, %arg5: memref<1x1xf32, #tpu.memory_space<vmem>>, %arg6: memref<1x1x1xf32, #tpu.memory_space<vmem>>) attributes {dimension_semantics = [#tpu.dimension_semantics<parallel>], iteration_bounds = array<i64: 2>, scalar_prefetch = 0 : i64, scratch_operands = 0 : i64, tpu.core_type = #tpu.core_type<tc>, window_params = [{transform_indices = @transform_0, window_bounds = array<i64: 1, 16, 64>}, {pipeline_mode = #tpu.pipeline_mode<synchronous>, transform_indices = @transform_1, window_bounds = array<i64: 7, 64, 128>}, {pipeline_mode = #tpu.pipeline_mode<synchronous>, transform_indices = @transform_2, window_bounds = array<i64: 1, 128>}, {pipeline_mode = #tpu.pipeline_mode<synchronous>, transform_indices = @transform_3, window_bounds = array<i64: 1, 128>}, {pipeline_mode = #tpu.pipeline_mode<synchronous>, transform_indices = @transform_4, window_bounds = array<i64: 1, 1>}, {transform_indices = @transform_5, window_bounds = array<i64: 1, 1, 1>}]} {
    %c0 = arith.constant 0 : index
    %c0_0 = arith.constant 0 : index
    %c0_1 = arith.constant 0 : index
    %0 = vector.load %arg1[%c0, %c0_0, %c0_1] : memref<1x16x64xf32, #tpu.memory_space<vmem>>, vector<1x16x64xf32>
    %1 = vector.shape_cast %0 : vector<1x16x64xf32> to vector<16x64xf32>
    %2 = vector.extract_strided_slice %1 {offsets = [0, 0], sizes = [10, 64], strides = [1, 1]} : vector<16x64xf32> to vector<10x64xf32>
    %c0_2 = arith.constant 0 : index
    %c0_3 = arith.constant 0 : index
    %c0_4 = arith.constant 0 : index
    %3 = vector.load %arg2[%c0_2, %c0_3, %c0_4] : memref<7x64x128xf32, #tpu.memory_space<vmem>>, vector<1x64x128xf32>
    %4 = vector.shape_cast %3 : vector<1x64x128xf32> to vector<64x128xf32>
    %cst = arith.constant dense<0.000000e+00> : vector<10x128xf32>
    %5 = tpu.matmul %2, %4, %cst {dimension_numbers = #tpu.dot_dimension_numbers<[1], [0], [0], [1], [0, 0, 1, 1], [], []>} : vector<10x64xf32>, vector<64x128xf32>, vector<10x128xf32> -> vector<10x128xf32>
    %6 = vector.extract_strided_slice %1 {offsets = [1, 0], sizes = [10, 64], strides = [1, 1]} : vector<16x64xf32> to vector<10x64xf32>
    %c1 = arith.constant 1 : index
    %c0_5 = arith.constant 0 : index
    %c0_6 = arith.constant 0 : index
    %7 = vector.load %arg2[%c1, %c0_5, %c0_6] : memref<7x64x128xf32, #tpu.memory_space<vmem>>, vector<1x64x128xf32>
    %8 = vector.shape_cast %7 : vector<1x64x128xf32> to vector<64x128xf32>
    %cst_7 = arith.constant dense<0.000000e+00> : vector<10x128xf32>
    %9 = tpu.matmul %6, %8, %cst_7 {dimension_numbers = #tpu.dot_dimension_numbers<[1], [0], [0], [1], [0, 0, 1, 1], [], []>} : vector<10x64xf32>, vector<64x128xf32>, vector<10x128xf32> -> vector<10x128xf32>
    %10 = arith.addf %5, %9 : vector<10x128xf32>
    %11 = vector.extract_strided_slice %1 {offsets = [2, 0], sizes = [10, 64], strides = [1, 1]} : vector<16x64xf32> to vector<10x64xf32>
    %c2 = arith.constant 2 : index
    %c0_8 = arith.constant 0 : index
    %c0_9 = arith.constant 0 : index
    %12 = vector.load %arg2[%c2, %c0_8, %c0_9] : memref<7x64x128xf32, #tpu.memory_space<vmem>>, vector<1x64x128xf32>
    %13 = vector.shape_cast %12 : vector<1x64x128xf32> to vector<64x128xf32>
    %cst_10 = arith.constant dense<0.000000e+00> : vector<10x128xf32>
    %14 = tpu.matmul %11, %13, %cst_10 {dimension_numbers = #tpu.dot_dimension_numbers<[1], [0], [0], [1], [0, 0, 1, 1], [], []>} : vector<10x64xf32>, vector<64x128xf32>, vector<10x128xf32> -> vector<10x128xf32>
    %15 = arith.addf %10, %14 : vector<10x128xf32>
    %16 = vector.extract_strided_slice %1 {offsets = [3, 0], sizes = [10, 64], strides = [1, 1]} : vector<16x64xf32> to vector<10x64xf32>
    %c3 = arith.constant 3 : index
    %c0_11 = arith.constant 0 : index
    %c0_12 = arith.constant 0 : index
    %17 = vector.load %arg2[%c3, %c0_11, %c0_12] : memref<7x64x128xf32, #tpu.memory_space<vmem>>, vector<1x64x128xf32>
    %18 = vector.shape_cast %17 : vector<1x64x128xf32> to vector<64x128xf32>
    %cst_13 = arith.constant dense<0.000000e+00> : vector<10x128xf32>
    %19 = tpu.matmul %16, %18, %cst_13 {dimension_numbers = #tpu.dot_dimension_numbers<[1], [0], [0], [1], [0, 0, 1, 1], [], []>} : vector<10x64xf32>, vector<64x128xf32>, vector<10x128xf32> -> vector<10x128xf32>
    %20 = arith.addf %15, %19 : vector<10x128xf32>
    %21 = vector.extract_strided_slice %1 {offsets = [4, 0], sizes = [10, 64], strides = [1, 1]} : vector<16x64xf32> to vector<10x64xf32>
    %c4 = arith.constant 4 : index
    %c0_14 = arith.constant 0 : index
    %c0_15 = arith.constant 0 : index
    %22 = vector.load %arg2[%c4, %c0_14, %c0_15] : memref<7x64x128xf32, #tpu.memory_space<vmem>>, vector<1x64x128xf32>
    %23 = vector.shape_cast %22 : vector<1x64x128xf32> to vector<64x128xf32>
    %cst_16 = arith.constant dense<0.000000e+00> : vector<10x128xf32>
    %24 = tpu.matmul %21, %23, %cst_16 {dimension_numbers = #tpu.dot_dimension_numbers<[1], [0], [0], [1], [0, 0, 1, 1], [], []>} : vector<10x64xf32>, vector<64x128xf32>, vector<10x128xf32> -> vector<10x128xf32>
    %25 = arith.addf %20, %24 : vector<10x128xf32>
    %26 = vector.extract_strided_slice %1 {offsets = [5, 0], sizes = [10, 64], strides = [1, 1]} : vector<16x64xf32> to vector<10x64xf32>
    %c5 = arith.constant 5 : index
    %c0_17 = arith.constant 0 : index
    %c0_18 = arith.constant 0 : index
    %27 = vector.load %arg2[%c5, %c0_17, %c0_18] : memref<7x64x128xf32, #tpu.memory_space<vmem>>, vector<1x64x128xf32>
    %28 = vector.shape_cast %27 : vector<1x64x128xf32> to vector<64x128xf32>
    %cst_19 = arith.constant dense<0.000000e+00> : vector<10x128xf32>
    %29 = tpu.matmul %26, %28, %cst_19 {dimension_numbers = #tpu.dot_dimension_numbers<[1], [0], [0], [1], [0, 0, 1, 1], [], []>} : vector<10x64xf32>, vector<64x128xf32>, vector<10x128xf32> -> vector<10x128xf32>
    %30 = arith.addf %25, %29 : vector<10x128xf32>
    %31 = vector.extract_strided_slice %1 {offsets = [6, 0], sizes = [10, 64], strides = [1, 1]} : vector<16x64xf32> to vector<10x64xf32>
    %c6 = arith.constant 6 : index
    %c0_20 = arith.constant 0 : index
    %c0_21 = arith.constant 0 : index
    %32 = vector.load %arg2[%c6, %c0_20, %c0_21] : memref<7x64x128xf32, #tpu.memory_space<vmem>>, vector<1x64x128xf32>
    %33 = vector.shape_cast %32 : vector<1x64x128xf32> to vector<64x128xf32>
    %cst_22 = arith.constant dense<0.000000e+00> : vector<10x128xf32>
    %34 = tpu.matmul %31, %33, %cst_22 {dimension_numbers = #tpu.dot_dimension_numbers<[1], [0], [0], [1], [0, 0, 1, 1], [], []>} : vector<10x64xf32>, vector<64x128xf32>, vector<10x128xf32> -> vector<10x128xf32>
    %35 = arith.addf %30, %34 : vector<10x128xf32>
    %c0_23 = arith.constant 0 : index
    %c0_24 = arith.constant 0 : index
    %36 = vector.load %arg3[%c0_23, %c0_24] : memref<1x128xf32, #tpu.memory_space<vmem>>, vector<1x128xf32>
    %37 = vector.broadcast %36 : vector<1x128xf32> to vector<10x128xf32>
    %38 = arith.addf %35, %37 : vector<10x128xf32>
    %cst_25 = arith.constant 0.000000e+00 : f32
    %39 = vector.broadcast %cst_25 : f32 to vector<10x128xf32>
    %40 = arith.maximumf %38, %39 : vector<10x128xf32>
    %c0_26 = arith.constant 0 : index
    %c0_27 = arith.constant 0 : index
    %41 = vector.load %arg4[%c0_26, %c0_27] : memref<1x128xf32, #tpu.memory_space<vmem>>, vector<1x128xf32>
    %42 = vector.broadcast %41 : vector<1x128xf32> to vector<10x128xf32>
    %43 = arith.mulf %40, %42 : vector<10x128xf32>
    %cst_28 = arith.constant dense<0.000000e+00> : vector<10xf32>
    %44 = vector.multi_reduction <add>, %43, %cst_28 [1] : vector<10x128xf32> to vector<10xf32>
    %45 = vector.shape_cast %44 : vector<10xf32> to vector<10x1xf32>
    %cst_29 = arith.constant dense<0.000000e+00> : vector<1xf32>
    %46 = vector.multi_reduction <add>, %45, %cst_29 [0] : vector<10x1xf32> to vector<1xf32>
    %47 = vector.shape_cast %46 : vector<1xf32> to vector<1x1xf32>
    %cst_30 = arith.constant 0.00999999977 : f32
    %48 = vector.broadcast %cst_30 : f32 to vector<1x1xf32>
    %49 = arith.mulf %47, %48 : vector<1x1xf32>
    %c0_31 = arith.constant 0 : index
    %c0_32 = arith.constant 0 : index
    %50 = vector.load %arg5[%c0_31, %c0_32] : memref<1x1xf32, #tpu.memory_space<vmem>>, vector<1x1xf32>
    %51 = arith.addf %49, %50 : vector<1x1xf32>
    %cst_33 = arith.constant 0.000000e+00 : f32
    %52 = vector.broadcast %cst_33 : f32 to vector<1x1xf32>
    %53 = arith.subf %52, %51 : vector<1x1xf32>
    %54 = math.exp %53 : vector<1x1xf32>
    %cst_34 = arith.constant 1.000000e+00 : f32
    %55 = vector.broadcast %cst_34 : f32 to vector<1x1xf32>
    %56 = arith.addf %55, %54 : vector<1x1xf32>
    %cst_35 = arith.constant 1.000000e+00 : f32
    %57 = vector.broadcast %cst_35 : f32 to vector<1x1xf32>
    %58 = arith.divf %57, %56 : vector<1x1xf32>
    %59 = vector.shape_cast %58 : vector<1x1xf32> to vector<1x1x1xf32>
    %c0_36 = arith.constant 0 : index
    %c0_37 = arith.constant 0 : index
    %c0_38 = arith.constant 0 : index
    %60 = vector.load %arg6[%c0_36, %c0_37, %c0_38] : memref<1x1x1xf32, #tpu.memory_space<vmem>>, vector<1x1x1xf32>
    tpu.vector_store %arg6[%c0_36, %c0_37, %c0_38], %59 {strides = array<i32>} : memref<1x1x1xf32, #tpu.memory_space<vmem>>, vector<1x1x1xf32>,
    return
  }
  func.func @transform_0(%arg0: i32) -> (i32, i32, i32) {
    %c0_i32 = arith.constant 0 : i32
    %c0_i32_0 = arith.constant 0 : i32
    %c0_i32_1 = arith.constant 0 : i32
    return %arg0, %c0_i32, %c0_i32_0 : i32, i32, i32
  }
  func.func @transform_1(%arg0: i32) -> (i32, i32, i32) {
    %c0_i32 = arith.constant 0 : i32
    %c0_i32_0 = arith.constant 0 : i32
    %c0_i32_1 = arith.constant 0 : i32
    %c0_i32_2 = arith.constant 0 : i32
    return %c0_i32, %c0_i32_0, %c0_i32_1 : i32, i32, i32
  }
  func.func @transform_2(%arg0: i32) -> (i32, i32) {
    %c0_i32 = arith.constant 0 : i32
    %c0_i32_0 = arith.constant 0 : i32
    %c0_i32_1 = arith.constant 0 : i32
    return %c0_i32, %c0_i32_0 : i32, i32
  }
  func.func @transform_3(%arg0: i32) -> (i32, i32) {
    %c0_i32 = arith.constant 0 : i32
    %c0_i32_0 = arith.constant 0 : i32
    %c0_i32_1 = arith.constant 0 : i32
    return %c0_i32, %c0_i32_0 : i32, i32
  }
  func.func @transform_4(%arg0: i32) -> (i32, i32) {
    %c0_i32 = arith.constant 0 : i32
    %c0_i32_0 = arith.constant 0 : i32
    %c0_i32_1 = arith.constant 0 : i32
    return %c0_i32, %c0_i32_0 : i32, i32
  }
  func.func @transform_5(%arg0: i32) -> (i32, i32, i32) {
    %c0_i32 = arith.constant 0 : i32
    %c0_i32_0 = arith.constant 0 : i32
    %c0_i32_1 = arith.constant 0 : i32
    return %arg0, %c0_i32, %c0_i32_0 : i32, i32, i32
  }
}

</mosaic_0001>

<bundles_post_ra>
// kernel: tile.16
= control target key start
LH: loop header
LB: loop body
LE: loop exit
PB: predicated region body
PF: predicated region fallthrough
CT: control target
= control target key end

     0   :  { %s28_s0 = inlined_call_operand.vmem [shape: f32[5], index: 0, kind: input, shape index: {}]   ;;  %s29_s1 = inlined_call_operand.vmem [shape: f32[10,5], index: 1, kind: output, shape index: {}]  }
   0x1   :  { %v4_v0 = vld [vmem:[%s28_s0] ss:$0 sm:$0xff] }
   0x2   :  { %5 = vst [vmem:[%s29_s1] sm:$0xff] %v4_v0 }
   0x3   :  { %8 = vst [vmem:[%s29_s1 + $0x8] sm:$0xff] %v4_v0 }

// kernel: tile.17
= control target key start
LH: loop header
LB: loop body
LE: loop exit
PB: predicated region body
PF: predicated region fallthrough
CT: control target
= control target key end

     0   :  { %s83_s10 = smov 45   ;;  %s84_s11 = smov 35   ;;  %vm3_vm0 = vcmask 39936   ;;  %vm9_vm1 = vcmask 408936   ;;  %vm15_vm2 = vcmask 367936   ;;  %vm21_vm3 = vcmask 326936   ;;  %s135_s0 = inlined_call_operand.vmem [shape: f32[10,5], index: 0, kind: input, shape index: {}]   ;;  %s136_s1 = inlined_call_operand.vmem [shape: f32[50], index: 1, kind: output, shape index: {}]  }
   0x1   :  { %v65_v0 = vld [vmem:[%s135_s0 + $0x9] sm:$0x1]   ;;  %v67_v1 = vld [vmem:[%s135_s0 + $0x7] sm:$0x1]   ;;  %v69_v2 = vld [vmem:[%s135_s0 + $0x5] sm:$0x1]  }
   0x2   :  { %7 = vrot.lane.b32.xlu0 %v65_v0, %s83_s10  ;;  %19 = vrot.lane.b32.xlu1 %v67_v1, %s84_s11  ;;  %s85_s14 = smov 25   ;;  %v66_v3 = vld [vmem:[%s135_s0 + $0x8] sm:$0x1]   ;;  %v68_v4 = vld [vmem:[%s135_s0 + $0x6] sm:$0x1]   ;;  %s86_s19 = smov 40  }
   0x3   :  { %31 = vrot.lane.b32.xlu2 %v69_v2, %s85_s14  ;;  %s87_s20 = smov 30   ;;  %v70_v5 = vld [vmem:[%s135_s0 + $0x4] sm:$0x1]   ;;  %s88_s23 = smov 20   ;;  %v71_v6 = vld [vmem:[%s135_s0 + $0x3] sm:$0x1]  }
   0x4   :  { %v72_v7 = vld [vmem:[%s135_s0 + $0x2] sm:$0x1]   ;;  %s89_s28 = smov 15   ;;  %s90_s29 = smov 10   ;;  %v73_v8 = vld [vmem:[%s135_s0 + $0x1] sm:$0x1]  }
   0x5   :  { %s91_s3 = smov 5   ;;  %v2_v9 = vld [vmem:[%s135_s0] sm:$0x1]   ;;  %vm27_vm4 = vcmask 285936   ;;  %vm33_vm5 = vcmask 244936   ;;  %vm39_vm6 = vcmask 203936  }
   0x6   :  { %4 = vst.msk [vmem:[#allocation0] sm:$0x1] %vm3_vm0, %v2_v9   ;;  %vm45_vm7 = vcmask 162936   ;;  %vm51_vm8 = vcmask 121936   ;;  %vm57_vm9 = vcmask 80936  }
   0xa   :  { %13 = vrot.lane.b32.xlu0 %v66_v3, %s86_s19  ;;  %25 = vrot.lane.b32.xlu1 %v68_v4, %s87_s20 }
   0xb   :  { %37 = vrot.lane.b32.xlu2 %v70_v5, %s88_s23 }
  0x12   :  { %43 = vrot.lane.b32.xlu0 %v71_v6, %s89_s28  ;;  %49 = vrot.lane.b32.xlu1 %v72_v7, %s90_s29 }
  0x13   :  { %55 = vrot.lane.b32.xlu2 %v73_v8, %s91_s3 }
  0x5d   :  { %v32_v10 = vpop.permute.xlu2 %31  }
  0x65   :  { %v38_v11 = vpop.permute.xlu2 %37  }
  0x6d   :  { %v56_v12 = vpop.permute.xlu2 %55  }
  0x74   :  { %v8_v13 = vpop.permute.xlu0 %7   ;;  %v20_v14 = vpop.permute.xlu1 %19  }
  0x75   :  { %10 = vst.msk [vmem:[#allocation0] sm:$0x1] %vm9_vm1, %v8_v13  }
  0x7c   :  { %v14_v15 = vpop.permute.xlu0 %13   ;;  %v26_v16 = vpop.permute.xlu1 %25  }
  0x7d   :  { %16 = vst.msk [vmem:[#allocation0] sm:$0x1] %vm15_vm2, %v14_v15  }
  0x7e   :  { %22 = vst.msk [vmem:[#allocation0] sm:$0x1] %vm21_vm3, %v20_v14  }
  0x7f   :  { %28 = vst.msk [vmem:[#allocation0] sm:$0x1] %vm27_vm4, %v26_v16  }
  0x80   :  { %34 = vst.msk [vmem:[#allocation0] sm:$0x1] %vm33_vm5, %v32_v10  }
  0x81   :  { %40 = vst.msk [vmem:[#allocation0] sm:$0x1] %vm39_vm6, %v38_v11  }
  0x84   :  { %v44_v17 = vpop.permute.xlu0 %43   ;;  %v50_v18 = vpop.permute.xlu1 %49  }
  0x85   :  { %46 = vst.msk [vmem:[#allocation0] sm:$0x1] %vm45_vm7, %v44_v17  }
  0x86   :  { %52 = vst.msk [vmem:[#allocation0] sm:$0x1] %vm51_vm8, %v50_v18  }
  0x87   :  { %58 = vst.msk [vmem:[#allocation0] sm:$0x1] %vm57_vm9, %v56_v12  }
  0x8e   :  { %v61_v19 = vld [vmem:[#allocation0] sm:$0x1] }
  0x8f   :  { %64 = vst [vmem:[%s136_s1] sm:$0x1] %v61_v19 }

// kernel: router_gap_forward.1
= control target key start
LH: loop header
LB: loop body
LE: loop exit
PB: predicated region body
PF: predicated region fallthrough
CT: control target
= control target key end

     0   :  { %s746_s20 = smov 0   ;;  %s979_s0 = inlined_call_operand.vmem [shape: f32[2,16,64], index: 0, kind: input, shape index: {}]   ;;  %s980_s1 = inlined_call_operand.vmem [shape: f32[7,64,128], index: 1, kind: input, shape index: {}]   ;;  %s981_s2 = inlined_call_operand.vmem [shape: f32[1,128], index: 2, kind: input, shape index: {}]   ;;  %s982_s3 = inlined_call_operand.vmem [shape: f32[1,128], index: 3, kind: input, shape index: {}]   ;;  %s983_s4 = inlined_call_operand.<no memory space> [shape: f32[1,1], index: 4, kind: input, shape index: {}]   ;;  %s984_s5 = inlined_call_operand.vmem [shape: f32[2,1,1], index: 5, kind: output, shape index: {}]  }
   0x1   :  { %v10_v0 = vstv %s983_s4 }
   0x2   :  { %11 = vst [vmem:[#allocation2] sm:$0x1] %v10_v0 }
   0x3 LB: > { %s611_s21 = sadd.s32 4294967295, %s711_s20   ;;  %p615_p0 = scmp.ge.s32.totalorder %s711_s20, 1  ;;  %s711_s20 = sphi %s746_s20, %s17_s20  }
   0x4   : > { %p189_p1 = scmp.lt.s32.totalorder %s711_s20, 3 }
   0x6   : > { %p190_p2 = pnand %p615_p0, %p189_p1 }
   0x7   : > { %p215_p3 = scmp.lt.s32.totalorder (!%p190_p2), %s611_s21, 1 }
   0x8   : > { %193 = sbr.rel (%p190_p2) target bundleno = 374 (0x176), region = 40 }
   0xd   : > { %v625_v1 = vld [vmem:[%s980_s1 + $0x78] sm:$0xff]  ;;  %v624_v5 = vld [vmem:[%s980_s1 + $0x70] sm:$0xff]  ;;  %v623_v9 = vld [vmem:[%s980_s1 + $0x68] sm:$0xff]  ;;  %s986_s21 = smov (!%p215_p3, %s611_s21), 1  ;;  %vm244_vm0 = vcmask 1046528   ;;  %vm312_vm1 = vcmask 1045504  }
   0xe   : > { %v232_v2 = vld [vmem:[%s980_s1 + $0x38] sm:$0xff]  ;;  %261 = vmatpush.msra.mxu0 %v625_v1  ;;  %v231_v6 = vld [vmem:[%s980_s1 + $0x30] sm:$0xff]  ;;  %v230_v10 = vld [vmem:[%s980_s1 + $0x28] sm:$0xff]  ;;  %s682_s25 = sshll.u32 %s986_s21, 4  ;;  %vm354_vm2 = vcmask 1044480   ;;  %vm248_vm3 = vcmask 523264   ;;  %s222_s4 = scalar_lea.vmem %s984_s5, %s986_s21 }
   0xf   : > { %v637_v3 = vld [vmem:[%s980_s1 + $0xb8] sm:$0xff]  ;;  %288 = vmatpush.msra.mxu1 %v232_v2  ;;  %v636_v7 = vld [vmem:[%s980_s1 + $0xb0] sm:$0xff]  ;;  %v635_v11 = vld [vmem:[%s980_s1 + $0xa8] sm:$0xff]  ;;  %s219_s15 = scalar_lea.vmem %s979_s0, %s682_s25  ;;  %vm396_vm4 = vcmask 1043456   ;;  %vm438_vm5 = vcmask 1042432   ;;  %vm480_vm6 = vcmask 1041408  }
  0x10   : > { %v647_v4 = vld [vmem:[%s980_s1 + $0xf8] sm:$0xff]  ;;  %328 = vmatpush.msra.mxu2 %v637_v3  ;;  %v646_v8 = vld [vmem:[%s980_s1 + $0xf0] sm:$0xff]  ;;  %262 = vmatpush.msra.mxu0 %v624_v5  ;;  %v645_v12 = vld [vmem:[%s980_s1 + $0xe8] sm:$0xff]  ;;  %vm562_vm9 = vcmask 0  }
  0x11   : > { %370 = vmatpush.msra.mxu3 %v647_v4  ;;  %289 = vmatpush.msra.mxu1 %v231_v6  ;;  %v622_v13 = vld [vmem:[%s980_s1 + $0x60] sm:$0xff]  ;;  %v621_v17 = vld [vmem:[%s980_s1 + $0x58] sm:$0xff]  ;;  %v620_v21 = vld [vmem:[%s980_s1 + $0x50] sm:$0xff] }
  0x12   : > { %329 = vmatpush.msra.mxu2 %v636_v7  ;;  %v229_v14 = vld [vmem:[%s980_s1 + $0x20] sm:$0xff]  ;;  %263 = vmatpush.msra.mxu0 %v623_v9  ;;  %v228_v18 = vld [vmem:[%s980_s1 + $0x18] sm:$0xff]  ;;  %v227_v22 = vld [vmem:[%s980_s1 + $0x10] sm:$0xff] }
  0x13   : > { %371 = vmatpush.msra.mxu3 %v646_v8  ;;  %290 = vmatpush.msra.mxu1 %v230_v10  ;;  %v634_v15 = vld [vmem:[%s980_s1 + $0xa0] sm:$0xff]  ;;  %v633_v19 = vld [vmem:[%s980_s1 + $0x98] sm:$0xff]  ;;  %v632_v23 = vld [vmem:[%s980_s1 + $0x90] sm:$0xff] }
  0x14   : > { %v644_v16 = vld [vmem:[%s980_s1 + $0xe0] sm:$0xff]  ;;  %330 = vmatpush.msra.mxu2 %v635_v11  ;;  %264 = vmatpush.msra.mxu0 %v622_v13  ;;  %v643_v20 = vld [vmem:[%s980_s1 + $0xd8] sm:$0xff]  ;;  %v642_v24 = vld [vmem:[%s980_s1 + $0xd0] sm:$0xff] }
  0x15   : > { %372 = vmatpush.msra.mxu3 %v645_v12  ;;  %291 = vmatpush.msra.mxu1 %v229_v14  ;;  %v619_v25 = vld [vmem:[%s980_s1 + $0x48] sm:$0xff]  ;;  %v838_v27 = vld [vmem:[%s219_s15] sm:$0xff]  ;;  %v677_v44 = vld [vmem:[%s980_s1 + $0x1b8] sm:$0xff] }
  0x16   : > { %331 = vmatpush.msra.mxu2 %v634_v15  ;;  %265 = vmatpush.msra.mxu0 %v621_v17  ;;  %v226_v26 = vld [vmem:[%s980_s1 + $0x8] sm:$0xff]  ;;  %v245_v31 = vrot.slane %v838_v27, 1  ;;  %v313_v32 = vrot.slane %v838_v27, 2  ;;  %v355_v33 = vrot.slane %v838_v27, 3  ;;  %v618_v34 = vld [vmem:[%s980_s1 + $0x40] sm:$0xff]  ;;  %v657_v45 = vld [vmem:[%s980_s1 + $0x138] sm:$0xff] }
  0x17   : > { %373 = vmatpush.msra.mxu3 %v644_v16  ;;  %292 = vmatpush.msra.mxu1 %v228_v18  ;;  %v631_v28 = vld [vmem:[%s980_s1 + $0x88] sm:$0xff]  ;;  %v225_v35 = vld [vmem:[%s980_s1] sm:$0xff]  ;;  %v667_v46 = vld [vmem:[%s980_s1 + $0x178] sm:$0xff]  ;;  %v397_v0 = vrot.slane %v838_v27, 4  ;;  %v439_v3 = vrot.slane %v838_v27, 5  ;;  %v481_v5 = vrot.slane %v838_v27, 6 }
  0x18   : > { %332 = vmatpush.msra.mxu2 %v633_v19  ;;  %266 = vmatpush.msra.mxu0 %v620_v21  ;;  %v641_v29 = vld [vmem:[%s980_s1 + $0xc8] sm:$0xff]  ;;  %v630_v39 = vld [vmem:[%s980_s1 + $0x80] sm:$0xff]  ;;  %v676_v47 = vld [vmem:[%s980_s1 + $0x1b0] sm:$0xff] }
  0x19   : > { %374 = vmatpush.msra.mxu3 %v643_v20  ;;  %293 = vmatpush.msra.mxu1 %v227_v22  ;;  %v846_v30 = vld [vmem:[%s219_s15 + $0x8] sm:$0xff]  ;;  %v640_v40 = vld [vmem:[%s980_s1 + $0xc0] sm:$0xff]  ;;  %v656_v48 = vld [vmem:[%s980_s1 + $0x130] sm:$0xff] }
  0x1a   : > { %333 = vmatpush.msra.mxu2 %v632_v23  ;;  %v246_v36 = vrot.slane %v846_v30, 1  ;;  %v314_v37 = vrot.slane %v846_v30, 2  ;;  %v356_v38 = vrot.slane %v846_v30, 3  ;;  %267 = vmatpush.msra.mxu0 %v619_v25  ;;  %v666_v49 = vld [vmem:[%s980_s1 + $0x170] sm:$0xff]  ;;  %v675_v50 = vld [vmem:[%s980_s1 + $0x1a8] sm:$0xff]  ;;  %v674_v53 = vld [vmem:[%s980_s1 + $0x1a0] sm:$0xff] }
  0x1b   : > { %375 = vmatpush.msra.mxu3 %v642_v24  ;;  %294 = vmatpush.msra.mxu1 %v226_v26  ;;  %v655_v51 = vld [vmem:[%s980_s1 + $0x128] sm:$0xff]  ;;  %v654_v54 = vld [vmem:[%s980_s1 + $0x120] sm:$0xff]  ;;  %v673_v56 = vld [vmem:[%s980_s1 + $0x198] sm:$0xff]  ;;  %v398_v1 = vrot.slane %v846_v30, 4  ;;  %v440_v4 = vrot.slane %v846_v30, 5  ;;  %v482_v6 = vrot.slane %v846_v30, 6 }
  0x1c   : > { %334 = vmatpush.msra.mxu2 %v631_v28  ;;  %v247_v41 = vsel %vm244_vm0, %v245_v31, %v246_v36  ;;  %268 = vmatpush.msra.mxu0 %v618_v34  ;;  %v315_v42 = vsel %vm312_vm1, %v313_v32, %v314_v37  ;;  %v357_v43 = vsel %vm354_vm2, %v355_v33, %v356_v38  ;;  %v665_v52 = vld [vmem:[%s980_s1 + $0x168] sm:$0xff]  ;;  %v664_v55 = vld [vmem:[%s980_s1 + $0x160] sm:$0xff]  ;;  %v653_v57 = vld [vmem:[%s980_s1 + $0x118] sm:$0xff] }
  0x1d   : > { %376 = vmatpush.msra.mxu3 %v641_v29  ;;  %295 = vmatpush.msra.mxu1 %v225_v35  ;;  %v663_v58 = vld [vmem:[%s980_s1 + $0x158] sm:$0xff]  ;;  %v672_v59 = vld [vmem:[%s980_s1 + $0x190] sm:$0xff]  ;;  %v671_v62 = vld [vmem:[%s980_s1 + $0x188] sm:$0xff]  ;;  %v399_v10 = vsel %vm396_vm4, %v397_v0, %v398_v1  ;;  %v441_v11 = vsel %vm438_vm5, %v439_v3, %v440_v4  ;;  %v483_v12 = vsel %vm480_vm6, %v481_v5, %v482_v6 }
  0x1e   : > { %335 = vmatpush.msra.mxu2 %v630_v39  ;;  %626 = vmatmul.msk.f32.vlgmr.msra.gmra.mxu0 %vm248_vm3, %v247_v41  ;;  %v652_v60 = vld [vmem:[%s980_s1 + $0x110] sm:$0xff]  ;;  %v651_v63 = vld [vmem:[%s980_s1 + $0x108] sm:$0xff]  ;;  %v670_v7 = vld [vmem:[%s980_s1 + $0x180] sm:$0xff] }
  0x1f   : > { %377 = vmatpush.msra.mxu3 %v640_v40  ;;  %628 = vmatmul.msk.f32.vlgmr.msra.gmra.mxu1 %vm248_vm3, %v838_v27  ;;  %v662_v61 = vld [vmem:[%s980_s1 + $0x150] sm:$0xff]  ;;  %v661_v2 = vld [vmem:[%s980_s1 + $0x148] sm:$0xff]  ;;  %v650_v8 = vld [vmem:[%s980_s1 + $0x100] sm:$0xff] }
  0x20   : > { %638 = vmatmul.msk.f32.vlgmr.msra.gmra.mxu2 %vm248_vm3, %v315_v42  ;;  %648 = vmatmul.msk.f32.vlgmr.msra.gmra.mxu3 %vm248_vm3, %v357_v43  ;;  %v660_v9 = vld [vmem:[%s980_s1 + $0x140] sm:$0xff] }
  0x21   : > { %496 = vmatpush.msrb.mxu2 %v677_v44  ;;  %412 = vmatpush.msrb.mxu0 %v657_v45  ;;  %v700_v42 = vld [vmem:[%s982_s3] ss:$0 sm:$0xff] }
  0x22   : > { %683 = vmatpush.msrb.mxu3 %v657_v45  ;;  %454 = vmatpush.msrb.mxu1 %v667_v46 }
  0x23   : > { %497 = vmatpush.msrb.mxu2 %v676_v47  ;;  %413 = vmatpush.msrb.mxu0 %v656_v48 }
  0x24   : > { %684 = vmatpush.msrb.mxu3 %v656_v48  ;;  %455 = vmatpush.msrb.mxu1 %v666_v49 }
  0x25   : > { %498 = vmatpush.msrb.mxu2 %v675_v50  ;;  %414 = vmatpush.msrb.mxu0 %v655_v51 }
  0x26   : > { %685 = vmatpush.msrb.mxu3 %v655_v51  ;;  %456 = vmatpush.msrb.mxu1 %v665_v52 }
  0x27   : > { %499 = vmatpush.msrb.mxu2 %v674_v53  ;;  %415 = vmatpush.msrb.mxu0 %v654_v54 }
  0x28   : > { %686 = vmatpush.msrb.mxu3 %v654_v54  ;;  %457 = vmatpush.msrb.mxu1 %v664_v55 }
  0x29   : > { %627 = vmatmul.msk.f32.gmra.mxu0 %vm248_vm3, %v246_v36  ;;  %629 = vmatmul.msk.f32.gmra.mxu1 %vm248_vm3, %v846_v30  ;;  %v699_v36 = vld [vmem:[%s981_s2] ss:$0 sm:$0xff] }
  0x2a   : > { %639 = vmatmul.msk.f32.gmra.mxu2 %vm248_vm3, %v314_v37  ;;  %649 = vmatmul.msk.f32.gmra.mxu3 %vm248_vm3, %v356_v38 }
  0x2b   : > { %500 = vmatpush.msrb.mxu2 %v673_v56  ;;  %416 = vmatpush.msrb.mxu0 %v653_v57 }
  0x2c   : > { %687 = vmatpush.msrb.mxu3 %v653_v57  ;;  %458 = vmatpush.msrb.mxu1 %v663_v58  ;;  %v541_v58 = vld [vmem:[#allocation2] sm:$0x1] }
  0x2d   : > { %501 = vmatpush.msrb.mxu2 %v672_v59  ;;  %417 = vmatpush.msrb.mxu0 %v652_v60 }
  0x2e   : > { %688 = vmatpush.msrb.mxu3 %v652_v60  ;;  %459 = vmatpush.msrb.mxu1 %v662_v61 }
  0x2f   : > { %502 = vmatpush.msrb.mxu2 %v671_v62  ;;  %418 = vmatpush.msrb.mxu0 %v651_v63 }
  0x30   : > { %689 = vmatpush.msrb.mxu3 %v651_v63  ;;  %460 = vmatpush.msrb.mxu1 %v661_v2 }
  0x31   : > { %503 = vmatpush.msrb.mxu2 %v670_v7  ;;  %419 = vmatpush.msrb.mxu0 %v650_v8 }
  0x32   : > { %690 = vmatpush.msrb.mxu3 %v650_v8  ;;  %461 = vmatpush.msrb.mxu1 %v660_v9 }
  0x33   : > { %658 = vmatmul.msk.f32.vlgmr.msrb.gmra.mxu0 %vm248_vm3, %v399_v10  ;;  %659 = vmatmul.msk.f32.vlgmr.msrb.gmra.mxu3 %vm248_vm3, %v398_v1 }
  0x34   : > { %668 = vmatmul.msk.f32.vlgmr.msrb.gmra.mxu1 %vm248_vm3, %v441_v11  ;;  %678 = vmatmul.msk.f32.vlgmr.msrb.gmra.mxu2 %vm248_vm3, %v483_v12 }
  0x3c   : > { %669 = vmatmul.msk.f32.gmra.mxu1 %vm248_vm3, %v440_v4  ;;  %679 = vmatmul.msk.f32.gmra.mxu2 %vm248_vm3, %v482_v6 }
  0x9b   : > { %v270_v16 = vpop.f32.mrf.mxu0 }
  0x9c   : > { %v297_v13 = vpop.f32.mrf.mxu1 }
  0x9d   : > { %v298_v23 = vadd.f32 %v297_v13, %v270_v16 }
  0xa3   : > { %v337_v14 = vpop.f32.mrf.mxu2  ;;  %v379_v15 = vpop.f32.mrf.mxu3 }
  0xa4   : > { %v343_v25 = vadd.f32 %v337_v14, %v298_v23 }
  0xa6   : > { %v300_v17 = vpop.f32.mrf.mxu1  ;;  %v273_v20 = vpop.f32.mrf.mxu0  ;;  %v385_v31 = vadd.f32 %v379_v15, %v343_v25 }
  0xa7   : > { %v301_v21 = vadd.f32 %v300_v17, %v273_v20 }
  0xad   : > { %v340_v18 = vpop.f32.mrf.mxu2  ;;  %v382_v19 = vpop.f32.mrf.mxu3 }
  0xae   : > { %v344_v24 = vadd.f32 %v340_v18, %v301_v21 }
  0xb0   : > { %v386_v28 = vadd.f32 %v382_v19, %v344_v24  ;;  %v421_v29 = vpop.f32.mrf.mxu0 }
  0xb1   : > { %v463_v22 = vpop.f32.mrf.mxu1  ;;  %v427_v33 = vadd.f32 %v421_v29, %v385_v31 }
  0xb3   : > { %v469_v38 = vadd.f32 %v463_v22, %v427_v33 }
  0xb6   : > { %v424_v26 = vpop.f32.mrf.mxu3 }
  0xb7   : > { %v505_v27 = vpop.f32.mrf.mxu2  ;;  %v428_v30 = vadd.f32 %v424_v26, %v386_v28 }
  0xb8   : > { %v511_v40 = vadd.f32 %v505_v27, %v469_v38 }
  0xb9   : > { %v466_v32 = vpop.f32.mrf.mxu1 }
  0xba   : > { %v470_v34 = vadd.f32 %v466_v32, %v428_v30  ;;  %v517_v44 = vadd.f32 %v699_v36, %v511_v40 }
  0xbc   : > { %v519_v46 = vmax.f32 %v517_v44, 0.0 }
  0xbe   : > { %v525_v47 = vmul.f32 %v700_v42, %v519_v46 }
  0xbf   : > { %v508_v35 = vpop.f32.mrf.mxu2 }
  0xc0   : > { %v512_v37 = vadd.f32 %v508_v35, %v470_v34 }
  0xc2   : > { %v518_v39 = vadd.f32 %v699_v36, %v512_v37 }
  0xc4   : > { %v520_v41 = vmax.f32 %v518_v39, 0.0 }
  0xc6   : > { %v526_v43 = vmul.f32 %v700_v42, %v520_v41 }
  0xc8   : > { %v529_v45 = vsel %vm480_vm6, %v526_v43, 0.0 }
  0xc9   : > { %530 = vadd.xlane.f32.xlu0 %v529_v45 }
  0xd1   : > { %527 = vadd.xlane.f32.xlu0 %v525_v47 }
 0x13c   : > { %v531_v48 = vpop.xlane.xlu0 %530 }
 0x13d   : > { %v532_v49 = vsel %vm480_vm6, %v531_v48, 0.0 }
 0x144   : > { %v528_v50 = vpop.xlane.xlu0 %527 }
 0x145   : > { %v533_v51 = vadd.f32 %v532_v49, %v528_v50 }
 0x147   : > { %v534_v52 = vrot.slane %v533_v51, 4 }
 0x149   : > { %v535_v53 = vadd.f32 %v534_v52, %v533_v51 }
 0x14b   : > { %v536_v54 = vrot.slane %v535_v53, 2 }
 0x14d   : > { %v537_v55 = vadd.f32 %v536_v54, %v535_v53 }
 0x14f   : > { %v538_v56 = vrot.slane %v537_v55, 1 }
 0x151   : > { %v539_v57 = vadd.f32 %v538_v56, %v537_v55 }
 0x153   : > { %v540_v59 = vmul.f32 0.01, %v539_v57 }
 0x155   : > { %v542_v60 = vadd.f32 %v541_v58, %v540_v59 }
 0x157   : > { %v543_v61 = vsub.f32 0.0, %v542_v60 }
 0x159   : > { %v544_v62 = vmul.f32 1.442695, %v543_v61 }
 0x15b   : > { %701 = vpow2.f32 %v544_v62 }
 0x161   : > { %v702_v63 = vpop.eup %701 }
 0x162   : > { %v546_v0 = vadd.f32 1.0, %v702_v63 }
 0x164   : > { %703 = vrcp.f32 %v546_v0  ;;  %v558_v4 = vand.u32 2147483648, %v546_v0  ;;  %v556_v6 = vand.u32 2147483647, %v546_v0  ;;  %vm552_vm8 = vweird.f32 %v546_v0 }
 0x166   : > { %v559_v8 = vor.u32 1.1754944e-38, %v558_v4  ;;  %vm557_vm11 = vcmp.eq.f32.partialorder %v556_v6, 8.507059e+37 }
 0x16a   : > { %v704_v1 = vpop.eup %703 }
 0x16b   : > { %v548_v2 = vmul.f32 %v704_v1, %v546_v0  ;;  %vm553_vm7 = vweird.f32 %v704_v1 }
 0x16c   : > { %vm554_vm10 = vmor %vm552_vm8, %vm553_vm7 }
 0x16d   : > { %v549_v3 = vsub.f32 1.0, %v548_v2 }
 0x16f   : > { %v550_v5 = vmul.f32 %v704_v1, %v549_v3 }
 0x171   : > { %v551_v7 = vadd.f32 %v704_v1, %v550_v5 }
 0x173   : > { %v555_v9 = vsel %vm554_vm10, %v704_v1, %v551_v7 }
 0x174   : > { %v560_v10 = vsel %vm557_vm11, %v559_v8, %v555_v9 }
 0x175   : > { %563 = vst.msk [vmem:[%s222_s4] sm:$0x1] %vm562_vm9, %v560_v10 }
 0x176 PF: > { %s17_s20 = sadd.s32 1, %s711_s20  }
 0x177   : > { %p14_p4 = scmp.ge.s32.totalorder %s17_s20, 4  }
 0x179   :  { %16 = sbr.rel (!%p14_p4) target bundleno = 3 (0x3), region = 76 }

</bundles_post_ra>
